<compile_context>
chip_gen: v7x
topology: tpu7x:2x2x1
jax: 0.10.0
libtpu: 0.0.40
codegen_flags: <defaults>
</compile_context>

<pallas_src>
import functools

import jax
import jax.numpy as jnp
from jax.experimental import pallas as pl
from jax.experimental.pallas import tpu as pltpu


def rotary_kernel(x_ref, cos_ref, sin_ref, o_ref):
    x = x_ref[0]                                  # (TS, H, Dh)
    dh2 = x.shape[-1] // 2
    x1 = x[..., :dh2]                             # (TS, H, Dh/2)
    x2 = x[..., dh2:]
    cos = cos_ref[...][:, None, :]                # (TS, 1, Dh/2) -> broadcast over heads
    sin = sin_ref[...][:, None, :]
    # PyTorch convention: y1 = x1*cos + x2*sin ; y2 = -x1*sin + x2*cos
    y1 = x1 * cos + x2 * sin
    y2 = x2 * cos - x1 * sin
    o_ref[0] = jnp.concatenate([y1, y2], axis=-1).astype(o_ref.dtype)


@functools.lru_cache(maxsize=32)
def _rope_tables(S, Dh, base):
    """(S, Dh/2) f32 cos/sin tables, cached per static (S, Dh, base)."""
    inv_freq = (1.0 / base) ** (jnp.arange(0, Dh, 2, dtype=jnp.float32) / Dh)
    freqs = jnp.outer(jnp.arange(S, dtype=jnp.float32), inv_freq)   # (S, Dh/2)
    return jnp.cos(freqs), jnp.sin(freqs)


def _pick_seq_tile(S, row_bytes, budget_bytes=24 << 20):
    """Rows per tile so 2x(in) + 2x(out) buffers stay under `budget_bytes`."""
    ts = budget_bytes // max(1, 4 * row_bytes)
    ts = min(ts, 512, S)          # >=512 rarely needed; keep many pipeline steps
    if ts < S:
        ts = max(16, (ts // 16) * 16)   # sublane-friendly for f32 and bf16
    return max(int(ts), 1)


def rotary(x, base=10000.0):
    B, S, H, Dh = x.shape
    assert Dh % 2 == 0, "head dim must be even for rotary embedding"
    Dh2 = Dh // 2
    cos_tab, sin_tab = _rope_tables(S, Dh, float(base))

    itemsize = jnp.dtype(x.dtype).itemsize
    TS = _pick_seq_tile(S, H * Dh * itemsize)
    n_s = pl.cdiv(S, TS)

    # Explicit VMEM budget: in+out double-buffered activation tiles + tables.
    buf_bytes = 4 * TS * H * Dh * itemsize + 4 * TS * Dh2 * 4
    vmem_limit = int(min(max(2 * buf_bytes, 4 << 20), 96 << 20))

    out = pl.pallas_call(
        rotary_kernel,
        out_shape=jax.ShapeDtypeStruct((B, S, H, Dh), x.dtype),
        grid=(B, n_s),
        in_specs=[
            pl.BlockSpec((1, TS, H, Dh), lambda b, s: (b, s, 0, 0)),  # activations
            pl.BlockSpec((TS, Dh2), lambda b, s: (s, 0)),              # cos (S, Dh/2)
            pl.BlockSpec((TS, Dh2), lambda b, s: (s, 0)),              # sin (S, Dh/2)
        ],
        out_specs=pl.BlockSpec((1, TS, H, Dh), lambda b, s: (b, s, 0, 0)),
        compiler_params=pltpu.CompilerParams(
            dimension_semantics=("parallel", "parallel"),
            vmem_limit_bytes=vmem_limit,
        ),
    )(x, cos_tab, sin_tab)
    return out


def reference(x, base=10000.0):
    """Pure-JAX mirror of the PyTorch Rotary.forward."""
    B, S, H, Dh = x.shape
    inv_freq = (1.0 / base) ** (jnp.arange(0, Dh, 2, dtype=jnp.float32) / Dh)
    freqs = jnp.outer(jnp.arange(S, dtype=jnp.float32), inv_freq)
    cos = jnp.cos(freqs)[None, :, None, :]
    sin = jnp.sin(freqs)[None, :, None, :]
    x1, x2 = x[..., : Dh // 2], x[..., Dh // 2:]
    y1 = x1 * cos + x2 * sin
    y2 = -x1 * sin + x2 * cos
    return jnp.concatenate([y1, y2], axis=-1).astype(x.dtype)


if __name__ == "__main__":
    B, S, H, Dh = 2, 8, 4, 32          # seq=8, 4 heads, head_dim=32
    key = jax.random.PRNGKey(0)
    x = jax.random.normal(key, (B, S, H, Dh), jnp.float32)

    out = rotary(x)
    out = jax.block_until_ready(out)

    ref = reference(x)
    assert out.shape == (B, S, H, Dh)
    assert jnp.allclose(out, ref, atol=1e-5, rtol=1e-5), "mismatch vs pure-JAX reference"

    # TODO(synk): the PyTorch module's stateful cos/sin cache (seq_len_cached
    # buffers) has no stateless-kernel equivalent; lru_cache over static
    # (S, Dh, base) plays the same role at trace time.
    print("KERNEL_OK")
</pallas_src>

<mosaic_0001>
module attributes {stable_mosaic.version = 11 : i64} {
  func.func @rotary_kernel(%arg0: i32, %arg1: i32, %arg2: memref<1x8x4x32xf32, #tpu.memory_space<vmem>>, %arg3: memref<8x16xf32, #tpu.memory_space<vmem>>, %arg4: memref<8x16xf32, #tpu.memory_space<vmem>>, %arg5: memref<1x8x4x32xf32, #tpu.memory_space<vmem>>) attributes {dimension_semantics = [#tpu.dimension_semantics<parallel>, #tpu.dimension_semantics<parallel>], iteration_bounds = array<i64: 2, 1>, scalar_prefetch = 0 : i64, scratch_operands = 0 : i64, tpu.core_type = #tpu.core_type<tc>, window_params = [{transform_indices = @transform_0, window_bounds = array<i64: 1, 8, 4, 32>}, {transform_indices = @transform_1, window_bounds = array<i64: 8, 16>}, {transform_indices = @transform_2, window_bounds = array<i64: 8, 16>}, {transform_indices = @transform_3, window_bounds = array<i64: 1, 8, 4, 32>}]} {
    %c0 = arith.constant 0 : index
    %c0_0 = arith.constant 0 : index
    %c0_1 = arith.constant 0 : index
    %c0_2 = arith.constant 0 : index
    %0 = vector.load %arg2[%c0, %c0_0, %c0_1, %c0_2] : memref<1x8x4x32xf32, #tpu.memory_space<vmem>>, vector<1x8x4x32xf32>
    %1 = vector.shape_cast %0 : vector<1x8x4x32xf32> to vector<8x4x32xf32>
    %2 = vector.extract_strided_slice %1 {offsets = [0, 0, 0], sizes = [8, 4, 16], strides = [1, 1, 1]} : vector<8x4x32xf32> to vector<8x4x16xf32>
    %3 = vector.extract_strided_slice %1 {offsets = [0, 0, 16], sizes = [8, 4, 16], strides = [1, 1, 1]} : vector<8x4x32xf32> to vector<8x4x16xf32>
    %c0_3 = arith.constant 0 : index
    %c0_4 = arith.constant 0 : index
    %4 = vector.load %arg3[%c0_3, %c0_4] : memref<8x16xf32, #tpu.memory_space<vmem>>, vector<8x16xf32>
    %5 = vector.shape_cast %4 : vector<8x16xf32> to vector<8x1x16xf32>
    %c0_5 = arith.constant 0 : index
    %c0_6 = arith.constant 0 : index
    %6 = vector.load %arg4[%c0_5, %c0_6] : memref<8x16xf32, #tpu.memory_space<vmem>>, vector<8x16xf32>
    %7 = vector.shape_cast %6 : vector<8x16xf32> to vector<8x1x16xf32>
    %8 = vector.broadcast %5 : vector<8x1x16xf32> to vector<8x4x16xf32>
    %9 = arith.mulf %2, %8 : vector<8x4x16xf32>
    %10 = vector.broadcast %7 : vector<8x1x16xf32> to vector<8x4x16xf32>
    %11 = arith.mulf %3, %10 : vector<8x4x16xf32>
    %12 = arith.addf %9, %11 : vector<8x4x16xf32>
    %13 = vector.broadcast %5 : vector<8x1x16xf32> to vector<8x4x16xf32>
    %14 = arith.mulf %3, %13 : vector<8x4x16xf32>
    %15 = vector.broadcast %7 : vector<8x1x16xf32> to vector<8x4x16xf32>
    %16 = arith.mulf %2, %15 : vector<8x4x16xf32>
    %17 = arith.subf %14, %16 : vector<8x4x16xf32>
    %18 = tpu.concatenate %12, %17 in 2 : vector<8x4x16xf32>, vector<8x4x16xf32> -> vector<8x4x32xf32>
    %c0_7 = arith.constant 0 : index
    %c0_8 = arith.constant 0 : index
    %c0_9 = arith.constant 0 : index
    %c0_10 = arith.constant 0 : index
    %19 = vector.load %arg5[%c0_7, %c0_8, %c0_9, %c0_10] : memref<1x8x4x32xf32, #tpu.memory_space<vmem>>, vector<1x8x4x32xf32>
    %20 = vector.shape_cast %19 : vector<1x8x4x32xf32> to vector<8x4x32xf32>
    %21 = vector.shape_cast %18 : vector<8x4x32xf32> to vector<1x8x4x32xf32>
    tpu.vector_store %arg5[%c0_7, %c0_8, %c0_9, %c0_10], %21 {strides = array<i32>} : memref<1x8x4x32xf32, #tpu.memory_space<vmem>>, vector<1x8x4x32xf32>,
    return
  }
  func.func @transform_0(%arg0: i32, %arg1: i32) -> (i32, i32, i32, i32) {
    %c0_i32 = arith.constant 0 : i32
    %c0_i32_0 = arith.constant 0 : i32
    %c0_i32_1 = arith.constant 0 : i32
    return %arg0, %arg1, %c0_i32, %c0_i32_0 : i32, i32, i32, i32
  }
  func.func @transform_1(%arg0: i32, %arg1: i32) -> (i32, i32) {
    %c0_i32 = arith.constant 0 : i32
    %c0_i32_0 = arith.constant 0 : i32
    return %arg1, %c0_i32 : i32, i32
  }
  func.func @transform_2(%arg0: i32, %arg1: i32) -> (i32, i32) {
    %c0_i32 = arith.constant 0 : i32
    %c0_i32_0 = arith.constant 0 : i32
    return %arg1, %c0_i32 : i32, i32
  }
  func.func @transform_3(%arg0: i32, %arg1: i32) -> (i32, i32, i32, i32) {
    %c0_i32 = arith.constant 0 : i32
    %c0_i32_0 = arith.constant 0 : i32
    %c0_i32_1 = arith.constant 0 : i32
    return %arg0, %arg1, %c0_i32, %c0_i32_0 : i32, i32, i32, i32
  }
}

</mosaic_0001>

<bundles_post_ra>
// kernel: tpu_custom_call.1
= control target key start
LH: loop header
LB: loop body
LE: loop exit
PB: predicated region body
PF: predicated region fallthrough
CT: control target
= control target key end

     0   :  { %8 = vsyncpa [#allocation3], 0  ;;  %s1461_s0 = inlined_call_operand.hbm [shape: f32[2,8,4,32], index: 0, kind: input, shape index: {}]   ;;  %s1462_s1 = inlined_call_operand.hbm [shape: f32[8,16], index: 1, kind: input, shape index: {}]   ;;  %s1463_s2 = inlined_call_operand.hbm [shape: f32[8,16], index: 2, kind: input, shape index: {}]   ;;  %s1464_s3 = inlined_call_operand.hbm [shape: f32[2,8,4,32], index: 3, kind: output, shape index: {}]  }
   0x1   :  { %10 = vsyncpa [#allocation3 + $0x1], 0 }
   0x2   :  { %11 = vsyncpa [#allocation6], 0 }
   0x3   :  { %12 = vsyncpa [#allocation4], 0 }
   0x4   :  { %14 = vsyncpa [#allocation4 + $0x1], 0  ;;  %s1060_s12 = smov 0   ;;  %s1062_s13 = smov 0  }
   0x5   :  { %s1064_s14 = smov 0   ;;  %s1066_s15 = smov 0  }
   0x6   :  { %s1068_s16 = smov 0   ;;  %s1070_s17 = smov 0  }
   0x7 LB: > { %s742_s18 = sadd.s32 4294967295, %s1027_s17   ;;  %s743_s19 = sadd.s32 4294967294, %s1027_s17   ;;  %s1027_s17 = sphi %s1070_s17, %s20_s17   ;;  %s1023_s16 = sphi %s1068_s16, %s1490_s16   ;;  %s1019_s15 = sphi %s1066_s15, %s1489_s15   ;;  %s1015_s14 = sphi %s1064_s14, %s1488_s14   ;;  %s1011_s13 = sphi %s1062_s13, %s1487_s13   ;;  %s1007_s12 = sphi %s1060_s12, %s1486_s12  }
   0x8   : > { %s41_s20 = sadd.s32 1, %s1015_s14  ;;  %p48_p0 = scmp.ne.s32.totalorder %s1015_s14, %s1011_s13 }
   0x9   : > { %p49_p1 = scmp.eq.s32.totalorder %s1027_s17, 0  ;;  %p54_p2 = scmp.ne.s32.totalorder %s1011_s13, %s1007_s12 }
   0xa   : > { %p1098_p3 = scmp.eq.s32.totalorder %s742_s18, 0  ;;  %p132_p4 = scmp.eq.s32.totalorder %s742_s18, 1 }
   0xb   : > { %p1102_p5 = por %p49_p1, %p48_p0  ;;  %p138_p6 = scmp.eq.s32.totalorder %s743_s19, 1 }
   0xc   : > { %s1471_s21 = scalar_select %p1098_p3, 1, 0 }
   0xd   : > { %p1108_p7 = por %p1098_p3, %p54_p2  ;;  %p1112_p8 = por %p132_p4, %p48_p0 }
   0xe   : > { %p1116_p9 = por %p138_p6, %p54_p2  ;;  %p744_p10 = scmp.ge.s32.totalorder %s1027_s17, 1 }
   0xf   : > { %s1473_s23 = scalar_select %p1108_p7, 1, 0 }
  0x10   : > { %s1474_s24 = scalar_select %p1112_p8, 1, 0 }
  0x11   : > { %s1475_s25 = scalar_select %p1116_p9, 1, 0 }
  0x12   : > { %p145_p11 = scmp.lt.s32.totalorder %s1027_s17, 3  ;;  %s1029_s27 = smov [#allocation5]  }
  0x13   : > { %s160_s28 = sshll.u32 %s1029_s27, 4  ;;  %p792_p1 = scmp.lt.s32.totalorder %s1027_s17, 2  ;;  %s161_s28 = int_to_ptr.vmem [resolvable:$true] %s160_s28 }
  0x14   : > { %p1123_p13 = pnand %p744_p10, %p145_p11  ;;  %s1030_s30 = smov [#allocation7]  }
  0x15   : > { %p1132_p4 = pnand %p792_p1, %p1102_p5  ;;  %s173_s4 = sshll.u32 %s1030_s30, 4  ;;  %s1142_s4 = int_to_ptr.vmem [resolvable:$true] %s173_s4 }
  0x16   : > { %s1476_s26 = scalar_select %p1123_p13, 1, 0 }
  0x17   : > { %p775_p0 = pneg %p1123_p13  ;;  %s855_s8 = scalar_lea.hbm %s1462_s1, 128 }
  0x18   : > { %s1477_s29 = scalar_select %p1132_p4, 1, 0 }
  0x19   : > { %p1138_p2 = pnand %p775_p0, %p1098_p3  ;;  %p856_p5 = scmp.ne.s32.totalorder %s1462_s1, %s855_s8 }
  0x1a   : > { %p862_p1 = scmp.lt.u32.totalorder %s855_s8, %s1462_s1 }
  0x1b   : > { %p857_p6 = pneg %p1138_p2 }
  0x1d   : > { %p858_p10 = pnand %p857_p6, %p856_p5 }
  0x1f   : > { %p859_p11 = pneg %p858_p10 }
  0x21   : > { %p864_p0 = pnand %p862_p1, %p859_p11 }
  0x23   : > { %867 = shalt.err (!%p864_p0)
}
  0x24   : > { %s868_s19 = scalar_lea.vmem %s161_s28, 128  ;;  %p876_p3 = scmp.lt.s32.totalorder %s161_s28, %s161_s28 }
  0x25   : > { %p869_p12 = scmp.ne.s32.totalorder %s161_s28, %s868_s19  ;;  %p877_p7 = scmp.lt.s32.totalorder %s868_s19, %s868_s19 }
  0x27   : > { %p871_p9 = pnand %p869_p12, %p857_p6  ;;  %p878_p13 = por %p877_p7, %p876_p3 }
  0x29   : > { %p872_p8 = pneg %p871_p9 }
  0x2b   : > { %p879_p4 = pnand %p878_p13, %p872_p8 }
  0x2d   : > { %882 = shalt.err (!%p879_p4)
}
  0x2e   : > { %778 = dma.hbm_to_vmem [thread:$0]  (!%p1138_p2), %s1462_s1, 128, %s161_s28, [#allocation6]  }
  0x2f   : > { %s883_s7 = scalar_lea.hbm %s1463_s2, 128 }
  0x30   : > { %p884_p9 = scmp.ne.s32.totalorder %s1463_s2, %s883_s7  ;;  %p890_p8 = scmp.lt.u32.totalorder %s883_s7, %s1463_s2 }
  0x32   : > { %p886_p3 = pnand %p884_p9, %p857_p6 }
  0x34   : > { %p887_p7 = pneg %p886_p3 }
  0x36   : > { %p892_p12 = pnand %p890_p8, %p887_p7 }
  0x38   : > { %895 = shalt.err (!%p892_p12)
}
  0x39   : > { %s896_s28 = scalar_lea.vmem %s1142_s4, 128  ;;  %p904_p10 = scmp.lt.s32.totalorder %s1142_s4, %s1142_s4 }
  0x3a   : > { %p897_p13 = scmp.ne.s32.totalorder %s1142_s4, %s896_s28  ;;  %p905_p11 = scmp.lt.s32.totalorder %s896_s28, %s896_s28 }
  0x3c   : > { %p899_p4 = pnand %p897_p13, %p857_p6  ;;  %p906_p1 = por %p905_p11, %p904_p10 }
  0x3e   : > { %p900_p5 = pneg %p899_p4 }
  0x40   : > { %p907_p0 = pnand %p906_p1, %p900_p5 }
  0x42   : > { %910 = shalt.err (!%p907_p0)
}
  0x43   : > { %781 = dma.hbm_to_vmem [thread:$0]  (!%p1138_p2), %s1463_s2, 128, %s1142_s4, [#allocation6]  }
  0x44   : > { %s32_s22 = sadd.s32 1, %s1023_s16  ;;  %s184_s27 = sand.u32 1, %s1015_s14  }
  0x45   : > { %p34_p6 = scmp.ge.s32.totalorder %s32_s22, 2  ;;  %s748_s30 = sshll.u32 %s184_s27, 5 }
  0x46   : > { %s761_s6 = sshll.u32 %s1023_s16, 9  ;;  %s188_s4 = scalar_lea.vmem [#allocation2], %s748_s30 }
  0x47   : > { %s1492_s22 = smov (%p34_p6, %s32_s22), 0  ;;  %s1199_s8 = scalar_lea.hbm %s1461_s0, %s761_s6 }
  0x48   : > { %s36_s9 = ssub.s32 %s1023_s16, %s1492_s22  ;;  %s197_s10 = sshll.u32 %s188_s4, 4  ;;  %s1203_s10 = int_to_ptr.vmem [resolvable:$true] %s197_s10 }
  0x49   : > { %p39_p2 = scmp.eq.s32.totalorder %s36_s9, 0  ;;  %s1210_s28 = scalar_lea.sflag [#allocation3], %s184_s27 }
  0x4a   : > { %s911_s18 = scalar_lea.hbm %s1199_s8, 512  ;;  %p1479_p3 = scmp.ne.s32.totalorder %s1477_s29, 0 }
  0x4b   : > { %s1208_s11 = scalar_select %p39_p2, %s1015_s14, %s41_s20  }
  0x4c   : > { %p912_p9 = scmp.ne.s32.totalorder %s1199_s8, %s911_s18  ;;  %p913_p7 = pneg %p1479_p3 }
  0x4d   : > { %s916_s30 = scalar_lea.hbm %s1461_s0, 1024  ;;  %p917_p13 = scmp.lt.u32.totalorder %s1199_s8, %s1461_s0 }
  0x4e   : > { %p914_p8 = pnand %p913_p7, %p912_p9  ;;  %p918_p4 = scmp.lt.u32.totalorder %s916_s30, %s911_s18 }
  0x4f   : > { %p920_p10 = scmp.lt.u32.totalorder %s911_s18, %s1199_s8 }
  0x50   : > { %p915_p12 = pneg %p914_p8  ;;  %p919_p5 = por %p918_p4, %p917_p13 }
  0x52   : > { %p921_p11 = por %p920_p10, %p919_p5 }
  0x54   : > { %p922_p1 = pnand %p921_p11, %p915_p12 }
  0x56   : > { %925 = shalt.err (!%p922_p1)
}
  0x57   : > { %s926_s20 = scalar_lea.vmem %s1203_s10, 512  ;;  %s1031_s27 = smov [#allocation2]  }
  0x58   : > { %p927_p0 = scmp.ne.s32.totalorder %s1203_s10, %s926_s20  ;;  %s931_s9 = sshll.u32 %s1031_s27, 4  ;;  %s932_s9 = int_to_ptr.vmem [resolvable:$false] %s931_s9 }
  0x59   : > { %s933_s4 = scalar_lea.vmem %s932_s9, 1024  ;;  %p934_p9 = scmp.lt.s32.totalorder %s1203_s10, %s932_s9 }
  0x5a   : > { %p929_p6 = pnand %p927_p0, %p913_p7  ;;  %p935_p8 = scmp.lt.s32.totalorder %s933_s4, %s926_s20 }
  0x5c   : > { %p930_p2 = pneg %p929_p6  ;;  %p936_p13 = por %p935_p8, %p934_p9 }
  0x5e   : > { %p937_p4 = pnand %p936_p13, %p930_p2 }
  0x60   : > { %940 = shalt.err (!%p937_p4)
}
  0x61   : > { %s1032_s18 = smov 64   ;;  %s1033_s19 = smov 4  }
  0x62   : > { %785 = dma.hbm_to_vmem [thread:$0]  (!%p1479_p3), %s1199_s8, 512, %s1203_s10, %s1210_s28, %s1032_s18, %s1032_s18, %s1033_s19  }
  0x63   : > { %p1480_p7 = scmp.ne.s32.totalorder %s1476_s26, 0 }
  0x64   : > { %s1241_s6 = sand.u32 (!%p1480_p7), 1, %s1011_s13   ;;  %p1481_p12 = scmp.ne.s32.totalorder (!%p1480_p7), %s1473_s23, 0 }
  0x65   : > { %209 = sbr.rel (%p1480_p7) target bundleno = 395 (0x18b), region = 32  ;;  %s752_s30 = sshll.u32 (!%p1480_p7), %s1241_s6, 5 }
  0x66   : > { %s212_s5 = scalar_lea.sflag (!%p1480_p7), [#allocation3], %s1241_s6  ;;  %s1247_s7 = scalar_lea.vmem (!%p1480_p7), [#allocation2], %s752_s30 }
  0x6c   : > { %994 = dma.done.wait (%p1481_p12), %s212_s5, 512  }
  0x6d   : > { %996 = vsyncadd (%p1481_p12), %s212_s5, 4294966784  ;;  %p1482_p3 = scmp.ne.s32.totalorder %s1471_s21, 0 }
  0x6f   : > { %998 = dma.done.wait (%p1482_p3), [#allocation6], 256  }
  0x70   : > { %1000 = vsyncadd (%p1482_p3), [#allocation6], 4294967040  ;;  %v262_v0 = vlaneseq  ;;  %v1034_v1 = vmov 1966171168   ;;  %v307_v6 = vld [vmem:[#allocation7] sm:$0xff]  ;;  %v256_v17 = vld [vmem:[#allocation5] sm:$0xff] }
  0x71   : > { %v260_v2 = vunpack.c.l.s4 %v1034_v1  ;;  %v309_v9 = vcombine.high %v307_v6, %v307_v6  ;;  %s1035_s21 = smov 16   ;;  %v258_v30 = vcombine.high %v256_v17, %v256_v17  ;;  %v1296_v50 = vld [vmem:[%s1247_s7] sm:$0xf]  ;;  %v1303_v52 = vld [vmem:[%s1247_s7 + $0x4] sm:$0xf]  ;;  %s1036_s23 = smov 112  }
  0x72   : > { %v263_v3 = vshrl.u32 %v262_v0, 7  ;;  %v1309_v54 = vld [vmem:[%s1247_s7 + $0x8] sm:$0xf]  ;;  %v1315_v56 = vld [vmem:[%s1247_s7 + $0xc] sm:$0xf]  ;;  %vm598_vm0 = vcmask 130048  }
  0x73   : > { %v261_v4 = vunpack.c.0.s8 %v260_v2  ;;  %v1320_v58 = vld [vmem:[%s1247_s7 + $0x10] sm:$0xf]  ;;  %v1325_v60 = vld [vmem:[%s1247_s7 + $0x14] sm:$0xf]  ;;  %vm607_vm1 = vcmask 257024   ;;  %s1367_s26 = scalar_lea.vmem [#allocation8], %s752_s30 }
  0x74   : > { %v360_v8 = vsub.s32 0, %v263_v3  ;;  %s762_s29 = sshll.u32 %s1019_s15, 9  ;;  %s632_s8 = sshll.u32 %s1367_s26, 4  ;;  %s1409_s8 = int_to_ptr.vmem [resolvable:$true] %s632_s8 }
  0x75   : > { %v264_v5 = vsub.s32 %v261_v4, %v263_v3  ;;  %s1407_s20 = scalar_lea.hbm %s1464_s3, %s762_s29  ;;  %s617_s15 = scalar_lea.sflag [#allocation4], %s1241_s6 }
  0x76   : > { %s941_s27 = scalar_lea.vmem %s1409_s8, 512  ;;  %p1483_p10 = scmp.ne.s32.totalorder %s1474_s24, 0 }
  0x77   : > { %v316_v7 = vrot.slane %v307_v6, %v264_v5  ;;  %v323_v12 = vrot.slane %v309_v9, %v264_v5  ;;  %v265_v24 = vrot.slane %v256_v17, %v264_v5  ;;  %v272_v35 = vrot.slane %v258_v30, %v264_v5  ;;  %v1339_v9 = vld [vmem:[%s1247_s7 + $0x18] sm:$0xf]  ;;  %p942_p5 = scmp.ne.s32.totalorder %s1409_s8, %s941_s27  ;;  %s1037_s9 = smov [#allocation8]  }
  0x78   : > { %s945_s4 = sshll.u32 %s1037_s9, 4  ;;  %s946_s4 = int_to_ptr.vmem [resolvable:$false] %s945_s4 }
  0x79   : > { %v332_v10 = vrot.slane %v316_v7, %v264_v5  ;;  %v324_v11 = vcombine.high %v316_v7, %v316_v7  ;;  %v325_v16 = vcombine.high %v323_v12, %v323_v12  ;;  %v339_v21 = vrot.slane %v323_v12, %v264_v5  ;;  %p943_p11 = pnand %p942_p5, %p1483_p10  ;;  %s947_s18 = scalar_lea.vmem %s946_s4, 1024 }
  0x7a   : > { %v273_v29 = vcombine.high %v265_v24, %v265_v24  ;;  %v281_v32 = vrot.slane %v265_v24, %v264_v5  ;;  %v274_v40 = vcombine.high %v272_v35, %v272_v35  ;;  %v288_v42 = vrot.slane %v272_v35, %v264_v5  ;;  %p948_p0 = scmp.lt.s32.totalorder %s1409_s8, %s946_s4  ;;  %p949_p6 = scmp.lt.s32.totalorder %s947_s18, %s941_s27 }
  0x7b   : > { %v409_v13 = vrot.slane %v332_v10, %v360_v8  ;;  %v354_v14 = vcombine.high %v332_v10, %v332_v10  ;;  %v346_v15 = vrot.slane %v324_v11, %v264_v5  ;;  %v353_v23 = vrot.slane %v325_v16, %v264_v5  ;;  %p944_p1 = pneg %p943_p11 }
  0x7c   : > { %v425_v25 = vrot.slane %v339_v21, %v360_v8  ;;  %v355_v26 = vcombine.high %v339_v21, %v339_v21  ;;  %v295_v34 = vrot.slane %v273_v29, %v264_v5  ;;  %v1269_v36 = vrot.slane %v281_v32, %v360_v8  ;;  %p950_p2 = por %p949_p6, %p948_p0 }
  0x7d   : > { %446 = vrot.lane.b32.xlu0 %v409_v13, %s1035_s21  ;;  %v417_v18 = vrot.slane %v354_v14, %v360_v8  ;;  %v413_v19 = vrot.slane %v346_v15, %v360_v8  ;;  %v356_v20 = vcombine.high %v346_v15, %v346_v15  ;;  %v429_v27 = vrot.slane %v353_v23, %v360_v8 }
  0x7e   : > { %v357_v28 = vcombine.high %v353_v23, %v353_v23  ;;  %v1262_v31 = vrot.slane %v355_v26, %v360_v8  ;;  %v303_v37 = vcombine.high %v281_v32, %v281_v32  ;;  %v1273_v38 = vrot.slane %v295_v34, %v360_v8  ;;  %p951_p9 = pnand %p950_p2, %p944_p1 }
  0x7f   : > { %450 = vrot.lane.b32.xlu1 %v417_v18, %s1035_s21  ;;  %v421_v22 = vrot.slane %v356_v20, %v360_v8  ;;  %v305_v39 = vcombine.high %v295_v34, %v295_v34  ;;  %v302_v44 = vrot.slane %v274_v40, %v264_v5  ;;  %v1285_v45 = vrot.slane %v288_v42, %v360_v8 }
  0x80   : > { %v1265_v33 = vrot.slane %v357_v28, %v360_v8  ;;  %v1277_v41 = vrot.slane %v303_v37, %v360_v8  ;;  %v304_v46 = vcombine.high %v288_v42, %v288_v42  ;;  %v550_v53 = vmul.f32 %v409_v13, %v1296_v50  ;;  %v1343_v13 = vld [vmem:[%s1247_s7 + $0x1c] sm:$0xf] }
  0x81   : > { %448 = vrot.lane.b32.xlu0 %v413_v19, %s1035_s21  ;;  %v1281_v43 = vrot.slane %v305_v39, %v360_v8  ;;  %v1289_v47 = vrot.slane %v302_v44, %v360_v8  ;;  %v306_v48 = vcombine.high %v302_v44, %v302_v44  ;;  %v551_v55 = vmul.f32 %v413_v19, %v1303_v52 }
  0x82   : > { %v1293_v49 = vrot.slane %v304_v46, %v360_v8  ;;  %v552_v57 = vmul.f32 %v417_v18, %v1309_v54  ;;  %v553_v59 = vmul.f32 %v421_v22, %v1315_v56  ;;  %v554_v61 = vmul.f32 %v425_v25, %v1320_v58 }
  0x83   : > { %452 = vrot.lane.b32.xlu1 %v421_v22, %s1035_s21  ;;  %v1300_v51 = vrot.slane %v306_v48, %v360_v8  ;;  %v555_v62 = vmul.f32 %v429_v27, %v1325_v60  ;;  %v556_v17 = vmul.f32 %v1262_v31, %v1339_v9  ;;  %v557_v18 = vmul.f32 %v1265_v33, %v1343_v13 }
  0x84   : > { %v399_v37 = vmul.f32 %v1273_v38, %v1303_v52  ;;  %v400_v39 = vmul.f32 %v1277_v41, %v1309_v54 }
  0x85   : > { %454 = vrot.lane.b32.xlu0 %v425_v25, %s1035_s21 }
  0x87   : > { %456 = vrot.lane.b32.xlu1 %v429_v27, %s1035_s21 }
  0x89   : > { %458 = vrot.lane.b32.xlu0 %v1262_v31, %s1035_s21 }
  0x8b   : > { %460 = vrot.lane.b32.xlu1 %v1265_v33, %s1035_s21  ;;  %v398_v33 = vmul.f32 %v1269_v36, %v1296_v50 }
  0x8d   : > { %518 = vrot.lane.b32.xlu0 %v1269_v36, %s1035_s21 }
  0x8f   : > { %520 = vrot.lane.b32.xlu1 %v1273_v38, %s1035_s21 }
  0x91   : > { %522 = vrot.lane.b32.xlu0 %v1277_v41, %s1035_s21 }
  0x93   : > { %524 = vrot.lane.b32.xlu1 %v1281_v43, %s1035_s21 }
  0x95   : > { %526 = vrot.lane.b32.xlu0 %v1285_v45, %s1035_s21 }
  0x97   : > { %528 = vrot.lane.b32.xlu1 %v1289_v47, %s1035_s21 }
  0x99   : > { %530 = vrot.lane.b32.xlu0 %v1293_v49, %s1035_s21 }
  0x9b   : > { %532 = vrot.lane.b32.xlu1 %v1300_v51, %s1035_s21 }
  0x9d   : > { %566 = vrot.lane.b32.xlu0 %v550_v53, %s1035_s21  ;;  %v402_v53 = vmul.f32 %v1285_v45, %v1320_v58  ;;  %v403_v45 = vmul.f32 %v1289_v47, %v1325_v60 }
  0x9f   : > { %568 = vrot.lane.b32.xlu1 %v551_v55, %s1035_s21 }
  0xa1   : > { %570 = vrot.lane.b32.xlu0 %v552_v57, %s1035_s21 }
  0xa3   : > { %572 = vrot.lane.b32.xlu1 %v553_v59, %s1035_s21 }
  0xa5   : > { %574 = vrot.lane.b32.xlu0 %v554_v61, %s1035_s21 }
  0xa7   : > { %576 = vrot.lane.b32.xlu1 %v555_v62, %s1035_s21 }
  0xef   : > { %v447_v63 = vpop.permute.xlu0 %446 }
  0xf0   : > { %v470_v0 = vmul.f32 %v447_v63, %v1296_v50 }
  0xf1   : > { %v451_v1 = vpop.permute.xlu1 %450 }
  0xf2   : > { %486 = vrot.lane.b32.xlu0 %v470_v0, %s1036_s23  ;;  %v472_v2 = vmul.f32 %v451_v1, %v1309_v54 }
  0xf3   : > { %v449_v3 = vpop.permute.xlu0 %448 }
  0xf4   : > { %v471_v4 = vmul.f32 %v449_v3, %v1303_v52 }
  0xf5   : > { %v453_v5 = vpop.permute.xlu1 %452 }
  0xf6   : > { %488 = vrot.lane.b32.xlu1 %v471_v4, %s1036_s23  ;;  %490 = vrot.lane.b32.xlu0 %v472_v2, %s1036_s23  ;;  %v473_v6 = vmul.f32 %v453_v5, %v1315_v56  ;;  %v404_v5 = vmul.f32 %v1293_v49, %v1339_v9 }
  0xf7   : > { %v455_v7 = vpop.permute.xlu0 %454 }
  0xf8   : > { %v474_v8 = vmul.f32 %v455_v7, %v1320_v58 }
  0xf9   : > { %v457_v10 = vpop.permute.xlu1 %456 }
  0xfa   : > { %492 = vrot.lane.b32.xlu1 %v473_v6, %s1036_s23  ;;  %494 = vrot.lane.b32.xlu0 %v474_v8, %s1036_s23  ;;  %v475_v11 = vmul.f32 %v457_v10, %v1325_v60 }
  0xfb   : > { %v459_v12 = vpop.permute.xlu0 %458 }
  0xfc   : > { %v476_v14 = vmul.f32 %v459_v12, %v1339_v9 }
  0xfd   : > { %v461_v15 = vpop.permute.xlu1 %460 }
  0xfe   : > { %496 = vrot.lane.b32.xlu1 %v475_v11, %s1036_s23  ;;  %498 = vrot.lane.b32.xlu0 %v476_v14, %s1036_s23  ;;  %v477_v16 = vmul.f32 %v461_v15, %v1343_v13  ;;  %v405_v14 = vmul.f32 %v1300_v51, %v1343_v13 }
  0xff   : > { %v519_v19 = vpop.permute.xlu0 %518 }
 0x100   : > { %v542_v32 = vmul.f32 %v519_v19, %v1296_v50 }
 0x101   : > { %v521_v20 = vpop.permute.xlu1 %520 }
 0x102   : > { %500 = vrot.lane.b32.xlu1 %v477_v16, %s1036_s23  ;;  %578 = vrot.lane.b32.xlu0 %v556_v17, %s1035_s21  ;;  %v543_v40 = vmul.f32 %v521_v20, %v1303_v52  ;;  %v401_v52 = vmul.f32 %v1281_v43, %v1315_v56 }
 0x103   : > { %v523_v21 = vpop.permute.xlu0 %522 }
 0x104   : > { %v544_v42 = vmul.f32 %v523_v21, %v1309_v54 }
 0x105   : > { %v525_v22 = vpop.permute.xlu1 %524 }
 0x106   : > { %580 = vrot.lane.b32.xlu1 %v557_v18, %s1035_s21  ;;  %v545_v36 = vmul.f32 %v525_v22, %v1315_v56 }
 0x107   : > { %v527_v23 = vpop.permute.xlu0 %526 }
 0x108   : > { %v546_v50 = vmul.f32 %v527_v23, %v1320_v58 }
 0x109   : > { %v529_v24 = vpop.permute.xlu1 %528 }
 0x10a   : > { %v547_v63 = vmul.f32 %v529_v24, %v1325_v60 }
 0x10b   : > { %v531_v25 = vpop.permute.xlu0 %530 }
 0x10c   : > { %v548_v8 = vmul.f32 %v531_v25, %v1339_v9 }
 0x10d   : > { %v533_v26 = vpop.permute.xlu1 %532 }
 0x10e   : > { %v549_v16 = vmul.f32 %v533_v26, %v1343_v13 }
 0x10f   : > { %v567_v27 = vpop.permute.xlu0 %566 }
 0x110   : > { %v590_v44 = vsub.f32 %v542_v32, %v567_v27 }
 0x111   : > { %v569_v28 = vpop.permute.xlu1 %568 }
 0x112   : > { %v591_v54 = vsub.f32 %v543_v40, %v569_v28 }
 0x113   : > { %v571_v29 = vpop.permute.xlu0 %570 }
 0x114   : > { %v592_v55 = vsub.f32 %v544_v42, %v571_v29 }
 0x115   : > { %v573_v30 = vpop.permute.xlu1 %572 }
 0x116   : > { %v593_v58 = vsub.f32 %v545_v36, %v573_v30 }
 0x117   : > { %v575_v31 = vpop.permute.xlu0 %574 }
 0x118   : > { %v594_v0 = vsub.f32 %v546_v50, %v575_v31 }
 0x119   : > { %v577_v34 = vpop.permute.xlu1 %576 }
 0x11a   : > { %v595_v60 = vsub.f32 %v547_v63, %v577_v34 }
 0x164   : > { %v487_v35 = vpop.permute.xlu0 %486 }
 0x165   : > { %v510_v46 = vadd.f32 %v487_v35, %v398_v33 }
 0x167   : > { %v599_v48 = vsel %vm598_vm0, %v510_v46, %v590_v44 }
 0x168   : > { %608 = vst.msk [vmem:[%s1367_s26] sm:$0xf] %vm607_vm1, %v599_v48  ;;  %v489_v38 = vpop.permute.xlu1 %488  ;;  %v491_v41 = vpop.permute.xlu0 %490 }
 0x169   : > { %v511_v57 = vadd.f32 %v489_v38, %v399_v37  ;;  %v512_v59 = vadd.f32 %v491_v41, %v400_v39 }
 0x16b   : > { %v600_v61 = vsel %vm598_vm0, %v511_v57, %v591_v54  ;;  %v601_v62 = vsel %vm598_vm0, %v512_v59, %v592_v55 }
 0x16c   : > { %609 = vst.msk [vmem:[%s1367_s26 + $0x4] sm:$0xf] %vm607_vm1, %v600_v61  ;;  %610 = vst.msk [vmem:[%s1367_s26 + $0x8] sm:$0xf] %vm607_vm1, %v601_v62  ;;  %v493_v43 = vpop.permute.xlu1 %492  ;;  %v495_v56 = vpop.permute.xlu0 %494 }
 0x16d   : > { %v513_v1 = vadd.f32 %v493_v43, %v401_v52  ;;  %v514_v2 = vadd.f32 %v495_v56, %v402_v53 }
 0x16f   : > { %v602_v3 = vsel %vm598_vm0, %v513_v1, %v593_v58  ;;  %v603_v4 = vsel %vm598_vm0, %v514_v2, %v594_v0 }
 0x170   : > { %611 = vst.msk [vmem:[%s1367_s26 + $0xc] sm:$0xf] %vm607_vm1, %v602_v3  ;;  %612 = vst.msk [vmem:[%s1367_s26 + $0x10] sm:$0xf] %vm607_vm1, %v603_v4  ;;  %v497_v6 = vpop.permute.xlu1 %496  ;;  %v499_v47 = vpop.permute.xlu0 %498 }
 0x171   : > { %v515_v7 = vadd.f32 %v497_v6, %v403_v45  ;;  %v516_v11 = vadd.f32 %v499_v47, %v404_v5 }
 0x173   : > { %v604_v10 = vsel %vm598_vm0, %v515_v7, %v595_v60 }
 0x174   : > { %613 = vst.msk [vmem:[%s1367_s26 + $0x14] sm:$0xf] %vm607_vm1, %v604_v10  ;;  %v501_v12 = vpop.permute.xlu1 %500  ;;  %v579_v49 = vpop.permute.xlu0 %578 }
 0x175   : > { %v596_v15 = vsub.f32 %v548_v8, %v579_v49  ;;  %v517_v18 = vadd.f32 %v501_v12, %v405_v14 }
 0x177   : > { %v605_v9 = vsel %vm598_vm0, %v516_v11, %v596_v15 }
 0x178   : > { %614 = vst.msk [vmem:[%s1367_s26 + $0x18] sm:$0xf] %vm607_vm1, %v605_v9  ;;  %v581_v17 = vpop.permute.xlu1 %580 }
 0x179   : > { %v597_v19 = vsub.f32 %v549_v16, %v581_v17 }
 0x17b   : > { %v606_v51 = vsel %vm598_vm0, %v517_v18, %v597_v19 }
 0x17c   : > { %615 = vst.msk [vmem:[%s1367_s26 + $0x1c] sm:$0xf] %vm607_vm1, %v606_v51 }
 0x17d   : > { %954 = shalt.err (!%p951_p9)
}
 0x17e   : > { %s955_s19 = scalar_lea.hbm %s1407_s20, 512  ;;  %s959_s7 = scalar_lea.hbm %s1464_s3, 1024 }
 0x17f   : > { %p956_p8 = scmp.ne.s32.totalorder %s1407_s20, %s955_s19  ;;  %p960_p7 = scmp.lt.u32.totalorder %s1407_s20, %s1464_s3 }
 0x180   : > { %p961_p12 = scmp.lt.u32.totalorder %s959_s7, %s955_s19  ;;  %p963_p5 = scmp.lt.u32.totalorder %s955_s19, %s1407_s20 }
 0x181   : > { %p957_p13 = pnand %p956_p8, %p1483_p10 }
 0x182   : > { %p962_p3 = por %p961_p12, %p960_p7 }
 0x183   : > { %p958_p4 = pneg %p957_p13 }
 0x184   : > { %p964_p11 = por %p963_p5, %p962_p3 }
 0x186   : > { %p965_p1 = pnand %p964_p11, %p958_p4 }
 0x188   : > { %968 = shalt.err (!%p965_p1)
}
 0x189   : > { %s1038_s26 = smov 64   ;;  %s1039_s29 = smov 4  }
 0x18a   : > { %773 = dma.vmem_to_hbm [thread:$0]  (%p1483_p10), %s1409_s8, 512, %s1407_s20, %s617_s15, %s1038_s26, %s1038_s26, %s1039_s29  }
 0x18b PF: > { %s647_s10 = sand.u32 1, %s1007_s12   ;;  %p1484_p0 = scmp.ne.s32.totalorder %s1475_s25, 0 }
 0x18c   : > { %p1485_p6 = scmp.ge.s32.totalorder %s1027_s17, 2  ;;  %s648_s28 = scalar_lea.sflag [#allocation4], %s647_s10 }
 0x18e   : > { %p787_p2 = pnand %p1485_p6, %p1484_p0 }
 0x190   : > { %1002 = dma.done.wait (!%p787_p2), %s648_s28, 512  }
 0x191   : > { %1004 = vsyncadd (!%p787_p2), %s648_s28, 4294966784  ;;  %s20_s17 = sadd.s32 1, %s1027_s17   ;;  %s1486_s12 = smov %s1011_s13 }
 0x192   : > { %p17_p9 = scmp.ge.s32.totalorder %s20_s17, 4   ;;  %s1487_s13 = smov %s1015_s14 }
 0x193   : > { %s1488_s14 = smov %s1208_s11  ;;  %s1489_s15 = smov %s1023_s16 }
 0x194   : > { %s1490_s16 = smov %s1492_s22  ;;  %19 = sbr.rel (!%p17_p9) target bundleno = 7 (0x7), region = 87 }
 0x19b   :  { %653 = vsyncpa [#allocation3], 1 }
 0x19c   :  { %655 = vsyncpa [#allocation3 + $0x1], 1 }
 0x19d   :  { %656 = vsyncpa [#allocation6], 1 }
 0x19e   :  { %657 = vsyncpa [#allocation4], 1 }
 0x19f   :  { %659 = vsyncpa [#allocation4 + $0x1], 1 }

</bundles_post_ra>
